<compile_context>
chip_gen: v6e
topology: v6e:2x2x1
jax: 0.10.0
libtpu: 0.0.40
codegen_flags: <defaults>
</compile_context>

<pallas_src>
import jax
import jax.numpy as jnp
from jax import lax
from jax.experimental import pallas as pl
from jax.experimental.pallas import tpu as pltpu


def _round_up(x, m):
    return ((x + m - 1) // m) * m


def mlp_detector_kernel(x_ref, w1_ref, b1_ref, w2_ref, b2_ref, w3t_ref, b3_ref, o_ref):
    """Fused Linear->ReLU->(Dropout=id)->Linear->ReLU->(Dropout=id)->Linear.

    Activations enter in the params' compute dtype (bf16 by default), every
    matmul accumulates in f32 on the MXU, bias-add/ReLU run in f32, and the
    activation is cast back before the next MXU pass.

    The third layer is computed transposed: out_t = w3t @ h2^T (the classic
    Q @ K^T contraction), so the kernel writes an (out_pad, tm) block whose
    lane dimension is the batch -> lane-dense stores with only out_pad (=8)
    f32 per row of HBM writeback instead of a 128-lane padded row.
    """
    cdt = x_ref.dtype
    x = x_ref[...]                                                     # (tm, in)

    # Layer 1: Linear + ReLU  (f32 accumulation, bias + ReLU in f32)
    h1 = jnp.dot(x, w1_ref[...], preferred_element_type=jnp.float32) + b1_ref[...]
    h1 = jnp.maximum(h1, 0.0).astype(cdt)
    # Dropout (eval/inference mode) -> identity.
    # TODO(synk): training-mode dropout would seed pltpu.prng_seed and build a
    # keep-mask from pltpu.prng_random_bits here.

    # Layer 2: Linear + ReLU
    h2 = jnp.dot(h1, w2_ref[...], preferred_element_type=jnp.float32) + b2_ref[...]
    h2 = jnp.maximum(h2, 0.0).astype(cdt)
    # Dropout (eval/inference mode) -> identity.

    # Layer 3: Linear (logits), computed transposed: (out_p, h2p) x (tm, h2p)^T
    out_t = lax.dot_general(
        w3t_ref[...], h2,
        dimension_numbers=(((1,), (1,)), ((), ())),
        preferred_element_type=jnp.float32,
    )                                                                  # (out_p, tm)
    out_t = out_t + b3_ref[...]                                        # (out_p, 1) lane-bcast
    o_ref[...] = out_t.astype(o_ref.dtype)


def mlp_detector_forward(x, params, *, max_single_block_batch=512, tm_large=2048):
    """Run the fused MLP kernel.

    x:      (B, input_size) float32 or bf16
    params: dict from init_params() -- already padded / bf16 / kernel layout.
    Returns (B, output_size) float32 logits.
    """
    B, in_dim = x.shape
    w1, b1 = params["w1"], params["b1"]
    w2, b2 = params["w2"], params["b2"]
    w3t, b3 = params["w3t"], params["b3"]
    out_dim = params["out_dim"]

    h1p = w1.shape[1]
    h2p = w2.shape[1]
    out_p = w3t.shape[0]
    assert w1.shape[0] == in_dim

    cdt = w1.dtype
    # bf16 activations halve the x HBM stream and hit the native MXU path.
    # (If the caller already holds bf16 activations this cast is a no-op.)
    x_in = x if x.dtype == cdt else x.astype(cdt)

    # ---- batch tiling -------------------------------------------------------
    # Per-grid-step pipeline overhead is ~0.35 us, so tiles are sized large.
    # Small batches run as ONE full-array block (tm == B: no divisibility
    # constraint, no padding of x).  For B > max_single_block_batch we force
    # >= 2 grid steps so that on v7x (2 TensorCores/chip) the "parallel" batch
    # axis can be sharded across both cores; on v5e/v6e the split is harmless.
    if B <= max_single_block_batch:
        tm = B
    else:
        tm = min(tm_large, _round_up(pl.cdiv(B, 2), 256))
    n_steps = pl.cdiv(B, tm)
    # A ragged last tile (B % tm != 0) is handled by Pallas boundary masking;
    # no padded copy of x is ever materialized in HBM.

    def const_spec(shape):
        if n_steps > 1:
            # Block index is constant across the grid -> a single buffer is enough.
            return pl.BlockSpec(shape, lambda i: tuple(0 for _ in shape),
                                pipeline_mode=pl.Buffered(1))
        return pl.BlockSpec(shape, lambda i: tuple(0 for _ in shape))

    itemsize = jnp.dtype(cdt).itemsize
    flops = 2 * B * (in_dim * h1p + h1p * h2p + h2p * out_p)
    bytes_accessed = (
        B * in_dim * itemsize                                   # x
        + (in_dim * h1p + h1p * h2p + out_p * h2p) * itemsize   # weights
        + (h1p + h2p + out_p) * 4                               # biases (f32)
        + out_p * B * 4                                         # logits (f32)
    )

    out_t = pl.pallas_call(
        mlp_detector_kernel,
        out_shape=jax.ShapeDtypeStruct((out_p, B), jnp.float32),
        grid_spec=pltpu.PrefetchScalarGridSpec(
            num_scalar_prefetch=0,
            grid=(n_steps,),
            in_specs=[
                pl.BlockSpec((tm, in_dim), lambda i: (i, 0)),   # x: tiled over batch
                const_spec((in_dim, h1p)),
                const_spec((1, h1p)),
                const_spec((h1p, h2p)),
                const_spec((1, h2p)),
                const_spec((out_p, h2p)),                       # w3 in (out, in) layout
                const_spec((out_p, 1)),
            ],
            # Transposed output: lane dim = batch -> lane-dense stores and only
            # out_p (=8) f32 per row of HBM writeback instead of 128.
            out_specs=pl.BlockSpec((out_p, tm), lambda i: (0, i)),
        ),
        compiler_params=pltpu.CompilerParams(
            # Only worth sharding across TensorCores when there are >= 2 tiles.
            dimension_semantics=("parallel",) if n_steps > 1 else ("arbitrary",),
        ),
        cost_estimate=pl.CostEstimate(
            flops=flops, transcendentals=0, bytes_accessed=bytes_accessed),
    )(x_in, w1, b1, w2, b2, w3t, b3)

    # (out_p, B) -> (B, out_dim); un-transpose + slice are tiny XLA ops.
    return out_t[:out_dim, :].T


def init_params(key, input_size, hidden_size_1, hidden_size_2, output_size,
                *, compute_dtype=jnp.bfloat16):
    """Deterministic init matching nn.Linear fan-in bounds, prepared ONCE in the
    kernel's layout (so nothing is padded/cast on the per-call hot path):

      * w1/w2 stored (in, out) so the kernel computes x @ W + b.
      * w3 stored in PyTorch (out, in) layout ("w3t") since the last layer is
        computed transposed in-kernel.
      * hidden dims zero-padded to 128 lanes, output dim to 8 sublanes (zeros
        are inert through ReLU / the next matmul).
      * weights cast to bf16 (portable MXU fast path on v5e/v6e/v7x); biases
        stay f32 (they add into the f32 accumulators).
      * input_size is intentionally NOT padded to 128: that would inflate the
        HBM x stream of a memory-bound kernel; the MXU handles K=32 fine.
    """
    h1p = _round_up(hidden_size_1, 128)
    h2p = _round_up(hidden_size_2, 128)
    outp = _round_up(output_size, 8)
    ks = jax.random.split(key, 6)

    def linear(kw, kb, fan_in, fan_out):
        bound = 1.0 / (fan_in ** 0.5)
        w = jax.random.uniform(kw, (fan_in, fan_out), jnp.float32, -bound, bound)
        b = jax.random.uniform(kb, (fan_out,), jnp.float32, -bound, bound)
        return w, b

    w1, b1 = linear(ks[0], ks[1], input_size, hidden_size_1)
    w2, b2 = linear(ks[2], ks[3], hidden_size_1, hidden_size_2)
    w3, b3 = linear(ks[4], ks[5], hidden_size_2, output_size)

    w1 = jnp.pad(w1, ((0, 0), (0, h1p - hidden_size_1))).astype(compute_dtype)
    b1 = jnp.pad(b1, (0, h1p - hidden_size_1)).reshape(1, h1p)
    w2 = jnp.pad(w2, ((0, h1p - hidden_size_1),
                      (0, h2p - hidden_size_2))).astype(compute_dtype)
    b2 = jnp.pad(b2, (0, h2p - hidden_size_2)).reshape(1, h2p)
    w3t = jnp.pad(w3.T, ((0, outp - output_size),
                         (0, h2p - hidden_size_2))).astype(compute_dtype)
    b3 = jnp.pad(b3, (0, outp - output_size)).reshape(outp, 1)

    return {"w1": w1, "b1": b1, "w2": w2, "b2": b2, "w3t": w3t, "b3": b3,
            "out_dim": output_size}


def reference_forward(x, p):
    """Pure-JAX reference with matching precision (bf16 inputs, f32 accumulation)."""
    cdt = p["w1"].dtype
    h1 = jnp.maximum(
        jnp.dot(x.astype(cdt), p["w1"], preferred_element_type=jnp.float32) + p["b1"], 0.0)
    h2 = jnp.maximum(
        jnp.dot(h1.astype(cdt), p["w2"], preferred_element_type=jnp.float32) + p["b2"], 0.0)
    out = jnp.dot(h2.astype(cdt), p["w3t"].T,
                  preferred_element_type=jnp.float32) + p["b3"].T
    return out[:, :p["out_dim"]]


if __name__ == "__main__":
    # MLPDetector(input_size=32, hidden_size_1=64, hidden_size_2=32,
    #             output_size=4, dropout_rate=0.5) -- dropout inactive at eval.
    B, INPUT, H1, H2, OUT = 16, 32, 64, 32, 4

    key = jax.random.PRNGKey(0)
    kx, kp = jax.random.split(key)
    x = jax.random.normal(kx, (B, INPUT), jnp.float32)
    params = init_params(kp, INPUT, H1, H2, OUT)

    out = mlp_detector_forward(x, params)
    out = jax.block_until_ready(out)

    ref = reference_forward(x, params)
    assert out.shape == (B, OUT), out.shape
    err = jnp.max(jnp.abs(out - ref))
    assert jnp.allclose(out, ref, atol=2e-2, rtol=2e-2), f"mismatch vs. reference, max abs err {err}"

    print("KERNEL_OK")
</pallas_src>

<mosaic_0001>
module attributes {stable_mosaic.version = 11 : i64} {
  func.func @mlp_detector_kernel(%arg0: i32, %arg1: memref<16x32xbf16, #tpu.memory_space<vmem>>, %arg2: memref<32x128xbf16, #tpu.memory_space<vmem>>, %arg3: memref<1x128xf32, #tpu.memory_space<vmem>>, %arg4: memref<128x128xbf16, #tpu.memory_space<vmem>>, %arg5: memref<1x128xf32, #tpu.memory_space<vmem>>, %arg6: memref<8x128xbf16, #tpu.memory_space<vmem>>, %arg7: memref<8x1xf32, #tpu.memory_space<vmem>>, %arg8: memref<8x16xf32, #tpu.memory_space<vmem>>) attributes {dimension_semantics = [#tpu.dimension_semantics<arbitrary>], iteration_bounds = array<i64: 1>, scalar_prefetch = 0 : i64, scratch_operands = 0 : i64, tpu.core_type = #tpu.core_type<tc>, window_params = [{transform_indices = @transform_0, window_bounds = array<i64: 16, 32>}, {pipeline_mode = #tpu.pipeline_mode<synchronous>, transform_indices = @transform_1, window_bounds = array<i64: 32, 128>}, {pipeline_mode = #tpu.pipeline_mode<synchronous>, transform_indices = @transform_2, window_bounds = array<i64: 1, 128>}, {pipeline_mode = #tpu.pipeline_mode<synchronous>, transform_indices = @transform_3, window_bounds = array<i64: 128, 128>}, {pipeline_mode = #tpu.pipeline_mode<synchronous>, transform_indices = @transform_4, window_bounds = array<i64: 1, 128>}, {pipeline_mode = #tpu.pipeline_mode<synchronous>, transform_indices = @transform_5, window_bounds = array<i64: 8, 128>}, {pipeline_mode = #tpu.pipeline_mode<synchronous>, transform_indices = @transform_6, window_bounds = array<i64: 8, 1>}, {transform_indices = @transform_7, window_bounds = array<i64: 8, 16>}]} {
    %c0 = arith.constant 0 : index
    %c0_0 = arith.constant 0 : index
    %0 = vector.load %arg1[%c0, %c0_0] : memref<16x32xbf16, #tpu.memory_space<vmem>>, vector<16x32xbf16>
    %c0_1 = arith.constant 0 : index
    %c0_2 = arith.constant 0 : index
    %1 = vector.load %arg2[%c0_1, %c0_2] : memref<32x128xbf16, #tpu.memory_space<vmem>>, vector<32x128xbf16>
    %cst = arith.constant dense<0.000000e+00> : vector<16x128xf32>
    %2 = tpu.matmul %0, %1, %cst {dimension_numbers = #tpu.dot_dimension_numbers<[1], [0], [0], [1], [0, 0, 1, 1], [], []>} : vector<16x32xbf16>, vector<32x128xbf16>, vector<16x128xf32> -> vector<16x128xf32>
    %c0_3 = arith.constant 0 : index
    %c0_4 = arith.constant 0 : index
    %3 = vector.load %arg3[%c0_3, %c0_4] : memref<1x128xf32, #tpu.memory_space<vmem>>, vector<1x128xf32>
    %4 = vector.broadcast %3 : vector<1x128xf32> to vector<16x128xf32>
    %5 = arith.addf %2, %4 : vector<16x128xf32>
    %cst_5 = arith.constant 0.000000e+00 : f32
    %6 = vector.broadcast %cst_5 : f32 to vector<16x128xf32>
    %7 = arith.maximumf %5, %6 : vector<16x128xf32>
    %8 = arith.truncf %7 : vector<16x128xf32> to vector<16x128xbf16>
    %c0_6 = arith.constant 0 : index
    %c0_7 = arith.constant 0 : index
    %9 = vector.load %arg4[%c0_6, %c0_7] : memref<128x128xbf16, #tpu.memory_space<vmem>>, vector<128x128xbf16>
    %cst_8 = arith.constant dense<0.000000e+00> : vector<16x128xf32>
    %10 = tpu.matmul %8, %9, %cst_8 {dimension_numbers = #tpu.dot_dimension_numbers<[1], [0], [0], [1], [0, 0, 1, 1], [], []>} : vector<16x128xbf16>, vector<128x128xbf16>, vector<16x128xf32> -> vector<16x128xf32>
    %c0_9 = arith.constant 0 : index
    %c0_10 = arith.constant 0 : index
    %11 = vector.load %arg5[%c0_9, %c0_10] : memref<1x128xf32, #tpu.memory_space<vmem>>, vector<1x128xf32>
    %12 = vector.broadcast %11 : vector<1x128xf32> to vector<16x128xf32>
    %13 = arith.addf %10, %12 : vector<16x128xf32>
    %cst_11 = arith.constant 0.000000e+00 : f32
    %14 = vector.broadcast %cst_11 : f32 to vector<16x128xf32>
    %15 = arith.maximumf %13, %14 : vector<16x128xf32>
    %16 = arith.truncf %15 : vector<16x128xf32> to vector<16x128xbf16>
    %c0_12 = arith.constant 0 : index
    %c0_13 = arith.constant 0 : index
    %17 = vector.load %arg6[%c0_12, %c0_13] : memref<8x128xbf16, #tpu.memory_space<vmem>>, vector<8x128xbf16>
    %cst_14 = arith.constant dense<0.000000e+00> : vector<8x16xf32>
    %18 = tpu.matmul %17, %16, %cst_14 {dimension_numbers = #tpu.dot_dimension_numbers<[1], [1], [0], [0], [0, 0, 1, 0], [], []>} : vector<8x128xbf16>, vector<16x128xbf16>, vector<8x16xf32> -> vector<8x16xf32>
    %c0_15 = arith.constant 0 : index
    %c0_16 = arith.constant 0 : index
    %19 = vector.load %arg7[%c0_15, %c0_16] : memref<8x1xf32, #tpu.memory_space<vmem>>, vector<8x1xf32>
    %20 = vector.broadcast %19 : vector<8x1xf32> to vector<8x16xf32>
    %21 = arith.addf %18, %20 : vector<8x16xf32>
    %c0_17 = arith.constant 0 : index
    %c0_18 = arith.constant 0 : index
    %22 = vector.load %arg8[%c0_17, %c0_18] : memref<8x16xf32, #tpu.memory_space<vmem>>, vector<8x16xf32>
    tpu.vector_store %arg8[%c0_17, %c0_18], %21 {strides = array<i32>} : memref<8x16xf32, #tpu.memory_space<vmem>>, vector<8x16xf32>,
    return
  }
  func.func @transform_0(%arg0: i32) -> (i32, i32) {
    %c0_i32 = arith.constant 0 : i32
    %c0_i32_0 = arith.constant 0 : i32
    return %arg0, %c0_i32 : i32, i32
  }
  func.func @transform_1(%arg0: i32) -> (i32, i32) {
    %c0_i32 = arith.constant 0 : i32
    %c0_i32_0 = arith.constant 0 : i32
    %c0_i32_1 = arith.constant 0 : i32
    return %c0_i32, %c0_i32_0 : i32, i32
  }
  func.func @transform_2(%arg0: i32) -> (i32, i32) {
    %c0_i32 = arith.constant 0 : i32
    %c0_i32_0 = arith.constant 0 : i32
    %c0_i32_1 = arith.constant 0 : i32
    return %c0_i32, %c0_i32_0 : i32, i32
  }
  func.func @transform_3(%arg0: i32) -> (i32, i32) {
    %c0_i32 = arith.constant 0 : i32
    %c0_i32_0 = arith.constant 0 : i32
    %c0_i32_1 = arith.constant 0 : i32
    return %c0_i32, %c0_i32_0 : i32, i32
  }
  func.func @transform_4(%arg0: i32) -> (i32, i32) {
    %c0_i32 = arith.constant 0 : i32
    %c0_i32_0 = arith.constant 0 : i32
    %c0_i32_1 = arith.constant 0 : i32
    return %c0_i32, %c0_i32_0 : i32, i32
  }
  func.func @transform_5(%arg0: i32) -> (i32, i32) {
    %c0_i32 = arith.constant 0 : i32
    %c0_i32_0 = arith.constant 0 : i32
    %c0_i32_1 = arith.constant 0 : i32
    return %c0_i32, %c0_i32_0 : i32, i32
  }
  func.func @transform_6(%arg0: i32) -> (i32, i32) {
    %c0_i32 = arith.constant 0 : i32
    %c0_i32_0 = arith.constant 0 : i32
    %c0_i32_1 = arith.constant 0 : i32
    return %c0_i32, %c0_i32_0 : i32, i32
  }
  func.func @transform_7(%arg0: i32) -> (i32, i32) {
    %c0_i32 = arith.constant 0 : i32
    %c0_i32_0 = arith.constant 0 : i32
    return %c0_i32, %arg0 : i32, i32
  }
}

</mosaic_0001>

<bundles_post_ra>
// kernel: tpu_custom_call.1
= control target key start
LH: loop header
LB: loop body
LE: loop exit
PB: predicated region body
PF: predicated region fallthrough
CT: control target
= control target key end

     0   :  { %12 = vsyncpa [#allocation3], 0  ;;  %s570_s0 = inlined_call_operand.vmem [shape: bf16[16,32], index: 0, kind: input, shape index: {}]   ;;  %s571_s1 = inlined_call_operand.hbm [shape: bf16[32,128], index: 1, kind: input, shape index: {}]   ;;  %s572_s2 = inlined_call_operand.hbm [shape: f32[1,128], index: 2, kind: input, shape index: {}]   ;;  %s573_s3 = inlined_call_operand.hbm [shape: bf16[128,128], index: 3, kind: input, shape index: {}]   ;;  %s574_s4 = inlined_call_operand.vmem [shape: f32[1,128], index: 4, kind: input, shape index: {}]   ;;  %s575_s5 = inlined_call_operand.vmem [shape: bf16[8,128], index: 5, kind: input, shape index: {}]   ;;  %s576_s6 = inlined_call_operand.vmem [shape: f32[8,1], index: 6, kind: input, shape index: {}]   ;;  %s577_s7 = inlined_call_operand.hbm [shape: f32[8,16], index: 7, kind: output, shape index: {}]  }
   0x1   :  { %13 = vsyncpa [#allocation6], 0 }
   0x2   :  { %14 = vsyncpa [#allocation4], 0  ;;  %s494_s24 = smov [#allocation5]   ;;  %s495_s26 = smov [#allocation2]  }
   0x3   :  { %s35_s25 = sshll.u32 %s494_s24, 4  ;;  %s22_s27 = sshll.u32 %s495_s26, 4  ;;  %s36_s25 = int_to_ptr.vmem [resolvable:$true] %s35_s25  ;;  %s23_s27 = int_to_ptr.vmem [resolvable:$true] %s22_s27 }
   0x4   :  { %s416_s28 = scalar_lea.vmem %s36_s25, 16  ;;  %s420_s29 = scalar_lea.vmem %s36_s25, 32 }
   0x5   :  { %p417_p0 = scmp.ne.s32.totalorder %s36_s25, %s416_s28  ;;  %p421_p1 = scmp.lt.s32.totalorder %s36_s25, %s36_s25 }
   0x6   :  { %p422_p2 = scmp.lt.s32.totalorder %s420_s29, %s416_s28 }
   0x8   :  { %p423_p3 = por %p422_p2, %p421_p1 }
   0xa   :  { %p424_p4 = pnand %p423_p3, %p417_p0 }
   0xc   :  { %427 = shalt.err (!%p424_p4)
}
   0xd   :  { %38 = dma.hbm_to_vmem [thread:$0]  %s572_s2, 16, %s36_s25, [#allocation6]  }
   0xe   :  { %s436_s9 = scalar_lea.vmem %s23_s27, 256  ;;  %p441_p6 = scmp.lt.s32.totalorder %s23_s27, %s23_s27 }
   0xf   :  { %p437_p5 = scmp.ne.s32.totalorder %s23_s27, %s436_s9  ;;  %p442_p7 = scmp.lt.s32.totalorder %s436_s9, %s436_s9 }
  0x11   :  { %p443_p8 = por %p442_p7, %p441_p6 }
  0x13   :  { %p444_p9 = pnand %p443_p8, %p437_p5 }
  0x15   :  { %447 = shalt.err (!%p444_p9)
}
  0x16   :  { %s496_s10 = smov 64   ;;  %s497_s11 = smov 4  }
  0x17   :  { %28 = dma.hbm_to_vmem [thread:$0]  %s571_s1, 256, %s23_s27, [#allocation3], %s496_s10, %s496_s10, %s497_s11  }
  0x18   :  { %s498_s14 = smov [#allocation7]  }
  0x19   :  { %s44_s15 = sshll.u32 %s498_s14, 4  ;;  %s45_s15 = int_to_ptr.vmem [resolvable:$true] %s44_s15 }
  0x1a   :  { %s456_s16 = scalar_lea.vmem %s45_s15, 1024  ;;  %p461_p11 = scmp.lt.s32.totalorder %s45_s15, %s45_s15 }
  0x1b   :  { %p457_p10 = scmp.ne.s32.totalorder %s45_s15, %s456_s16  ;;  %p462_p12 = scmp.lt.s32.totalorder %s456_s16, %s456_s16 }
  0x1d   :  { %p463_p13 = por %p462_p12, %p461_p11 }
  0x1f   :  { %p464_p0 = pnand %p463_p13, %p457_p10 }
  0x21   :  { %467 = shalt.err (!%p464_p0)
}
  0x22   :  { %50 = dma.hbm_to_vmem [thread:$0]  %s573_s3, 1024, %s45_s15, [#allocation6], %s496_s10, %s496_s10, %s497_s11  }
  0x23   :  { %488 = dma.done.wait [#allocation3], 256  }
  0x24   :  { %489 = vsyncadd [#allocation3], 4294967040 }
  0x25   :  { %490 = dma.done.wait [#allocation6], 1040  }
  0x26   :  { %491 = vsyncadd [#allocation6], 4294966256  ;;  %v499_v0 = vmov 0.0   ;;  %vm500_vm0 = vmmov 0   ;;  %v397_v1 = vld [vmem:[#allocation2 + $0x8] sm:$0xff]   ;;  %v398_v2 = vld [vmem:[#allocation2] sm:$0xff]  }
  0x27   :  { %353 = vmatprep.subr.bf16.mxu0 %v499_v0  ;;  %357 = vmatprep.mubr.msk.bf16.mxu0 %vm500_vm0, %v499_v0  ;;  %v400_v3 = vld [vmem:[#allocation7 + $0x38] sm:$0xff]   ;;  %v399_v4 = vld [vmem:[%s570_s0] sm:$0xff]   ;;  %vm97_vm1 = vcmask 261120   ;;  %v403_v7 = vld [vmem:[#allocation7 + $0x20] sm:$0xff]   ;;  %v501_v23 = vmov 0   ;;  %vm307_vm2 = vcmask 130048  }
  0x28   :  { %361 = vmatprep.subr.bf16.mxu1 %v499_v0  ;;  %377 = vmatprep.mubr.msk.bf16.mxu1 %vm500_vm0, %v499_v0  ;;  %v401_v5 = vld [vmem:[#allocation7 + $0x30] sm:$0xff]   ;;  %v402_v6 = vld [vmem:[#allocation7 + $0x28] sm:$0xff]   ;;  %v404_v8 = vld [vmem:[#allocation7 + $0x18] sm:$0xff]  }
  0x29   :  { %354 = vmatpush3.bf16.msra.mxu0 %v397_v1  ;;  %362 = vmatpush3.bf16.msra.mxu1 %v400_v3  ;;  %v405_v9 = vld [vmem:[#allocation7 + $0x10] sm:$0xff]   ;;  %v406_v10 = vld [vmem:[#allocation7 + $0x8] sm:$0xff]   ;;  %v407_v11 = vld [vmem:[#allocation7] sm:$0xff]  }
  0x2a   :  { %355 = vmatprep.subr.bf16.mxu0 %v499_v0  ;;  %363 = vmatprep.subr.bf16.mxu1 %v499_v0  ;;  %v325_v12 = vld [vmem:[#allocation5] ss:$0 sm:$0xff]  ;;  %v261_v22 = vld [vmem:[%s576_s6] sm:$0xff]  ;;  %s502_s6 = smov [#allocation8]  }
  0x2b   :  { %396 = vset.pattern.permute.xlu0 %v501_v23  ;;  %v330_v24 = vld [vmem:[%s574_s4] ss:$0 sm:$0xff]  ;;  %s315_s23 = sshll.u32 %s502_s6, 4  ;;  %s316_s23 = int_to_ptr.vmem [resolvable:$true] %s315_s23 }
  0x2c   :  { %264 = vperm.xlu0 %396, %v261_v22   ;;  %v260_v34 = vld [vmem:[%s575_s5] sm:$0xf]  ;;  %s468_s4 = scalar_lea.vmem %s316_s23, 128  ;;  %p473_p2 = scmp.lt.s32.totalorder %s316_s23, %s316_s23 }
  0x2d   :  { %356 = vmatpush3.bf16.msra.mxu0 %v398_v2  ;;  %364 = vmatpush3.bf16.msra.mxu1 %v401_v5  ;;  %p469_p1 = scmp.ne.s32.totalorder %s316_s23, %s468_s4  ;;  %p474_p3 = scmp.lt.s32.totalorder %s468_s4, %s468_s4 }
  0x2e   :  { %381 = vmatprep.subr.bf16.mxu0 %v499_v0  ;;  %365 = vmatprep.subr.bf16.mxu1 %v499_v0 }
  0x2f   :  { %p475_p4 = por %p474_p3, %p473_p2 }
  0x30   :  { %358 = vmatmul.mubr.msk.bf16.vlgmr.msra.gmra.mxu0 %vm97_vm1, %v399_v4 }
  0x31   :  { %383 = vmatprep.mubr.msk.bf16.mxu0 %vm500_vm0, %v499_v0  ;;  %366 = vmatpush3.bf16.msra.mxu1 %v402_v6  ;;  %p476_p5 = pnand %p475_p4, %p469_p1 }
  0x32   :  { %367 = vmatprep.subr.bf16.mxu1 %v499_v0 }
  0x35   :  { %368 = vmatpush3.bf16.msra.mxu1 %v403_v7 }
  0x36   :  { %369 = vmatprep.subr.bf16.mxu1 %v499_v0 }
  0x39   :  { %370 = vmatpush3.bf16.msra.mxu1 %v404_v8 }
  0x3a   :  { %371 = vmatprep.subr.bf16.mxu1 %v499_v0 }
  0x3d   :  { %372 = vmatpush3.bf16.msra.mxu1 %v405_v9 }
  0x3e   :  { %373 = vmatprep.subr.bf16.mxu1 %v499_v0 }
  0x41   :  { %374 = vmatpush3.bf16.msra.mxu1 %v406_v10 }
  0x42   :  { %375 = vmatprep.subr.bf16.mxu1 %v499_v0 }
  0x45   :  { %376 = vmatpush3.bf16.msra.mxu1 %v407_v11 }
  0xa7   :  { %v265_v35 = vpop.permute.xlu0 %264 }
  0xf0   :  { %v135_v13 = vpop.f32.mrf.mxu0 }
  0xf1   :  { %v136_v15 = vadd.f32 %v325_v12, %v135_v13 }
  0xf2   :  { %v359_v14 = vpop.f32.mrf.mxu0 }
  0xf3   :  { %v142_v19 = vmax.f32 %v136_v15, 0.0 }
  0xf4   :  { %v138_v16 = vpop.f32.mrf.mxu0 }
  0xf5   :  { %v139_v17 = vadd.f32 %v325_v12, %v138_v16 }
  0xf6   :  { %v360_v18 = vpop.f32.mrf.mxu0 }
  0xf7   :  { %v143_v20 = vmax.f32 %v139_v17, 0.0 }
  0xf9   :  { %v144_v21 = vpack.c.bf16 %v143_v20, %v142_v19 }
  0xfb   :  { %378 = vmatmul.mubr.bf16.vlgmr.msra.gmra.mxu1 %v144_v21 }
 0x1bb   :  { %v250_v25 = vpop.f32.mrf.mxu1 }
 0x1bc   :  { %v251_v27 = vadd.f32 %v330_v24, %v250_v25 }
 0x1bd   :  { %v379_v26 = vpop.f32.mrf.mxu1 }
 0x1be   :  { %v257_v31 = vmax.f32 %v251_v27, 0.0 }
 0x1bf   :  { %v253_v28 = vpop.f32.mrf.mxu1 }
 0x1c0   :  { %v254_v29 = vadd.f32 %v330_v24, %v253_v28 }
 0x1c1   :  { %v380_v30 = vpop.f32.mrf.mxu1 }
 0x1c2   :  { %v258_v32 = vmax.f32 %v254_v29, 0.0 }
 0x1c4   :  { %v259_v33 = vpack.c.bf16 %v258_v32, %v257_v31 }
 0x1c6   :  { %382 = vmatpush3.bf16.xpose.msra.mxu0 %v259_v33 }
 0x1cd   :  { %384 = vmatmul.mubr.bf16.vlgmr.msra.gmra.mxu0 %v260_v34 }
 0x28d   :  { %v301_v36 = vpop.f32.mrf.mxu0 }
 0x28e   :  { %v302_v37 = vadd.f32 %v301_v36, %v265_v35 }
 0x28f   :  { %v385_v38 = vpop.f32.mrf.mxu0 }
 0x290   :  { %308 = vst.msk [vmem:[#allocation8] sm:$0xff] %vm307_vm2, %v302_v37 }
 0x291   :  { %v304_v39 = vpop.f32.mrf.mxu0 }
 0x292   :  { %479 = shalt.err (!%p476_p5)
}
 0x293   :  { %318 = dma.vmem_to_hbm [thread:$0]  %s316_s23, 128, %s577_s7, [#allocation4]   ;;  %v386_v40 = vpop.f32.mrf.mxu0 }
 0x294   :  { %492 = dma.done.wait [#allocation4], 128  }
 0x295   :  { %493 = vsyncadd [#allocation4], 4294967168 }
 0x296   :  { %322 = vsyncpa [#allocation3], 1 }
 0x297   :  { %323 = vsyncpa [#allocation6], 1 }
 0x298   :  { %324 = vsyncpa [#allocation4], 1 }

</bundles_post_ra>
